<compile_context>
chip_gen: v6e
topology: v6e:2x2x1
jax: 0.10.0
libtpu: 0.0.40
codegen_flags: <defaults>
</compile_context>

<pallas_src>
import functools

import jax
import jax.numpy as jnp
from jax.experimental import pallas as pl
from jax.experimental.pallas import tpu as pltpu

TB_MAX = 4096  # batch-tile cap (multiple of 8); ~1.3 MiB double-buffered tiles


def _round_up(n, m):
    return ((n + m - 1) // m) * m


def actor_critic_kernel(
    x_ref,
    w_s_ref, b_s_ref,     # shared:  [state_dim, HP], [1, HP]  (cols >= H are zero)
    w_h_ref, b_h_ref,     # fused actor/critic hidden: [HP, H2], [1, H2]
    w_o_ref, b_o_ref,     # fused block-diag output:   [H2, OUT_W], [1, OUT_W]
    out_ref,              # (TB, OUT_W) narrow output slab
    *, action_dim,
):
    x = x_ref[...]

    # shared = tanh(x @ Ws + bs); padded lanes are tanh(0) == 0 exactly.
    h = jnp.tanh(
        jnp.dot(x, w_s_ref[...], preferred_element_type=jnp.float32) + b_s_ref[...]
    )

    # fused actor/critic hidden layers: one full 128-lane MXU push + one tanh.
    hc = jnp.tanh(
        jnp.dot(h, w_h_ref[...], preferred_element_type=jnp.float32) + b_h_ref[...]
    )

    # fused block-diagonal output projection (only OUT_W lanes wide):
    #   lanes 0:action_dim -> actor logits, lane action_dim -> critic value.
    z = (
        jnp.dot(hc, w_o_ref[...], preferred_element_type=jnp.float32) + b_o_ref[...]
    )

    lane = jax.lax.broadcasted_iota(jnp.int32, z.shape, 1)
    is_logit = lane < action_dim
    is_value = lane == action_dim

    # masked, max-subtracted softmax over the logit lanes only.
    # exp(-1e30 - m) underflows to exactly 0, so no second select is needed.
    masked = jnp.where(is_logit, z, jnp.float32(-1e30))
    m = jnp.max(masked, axis=-1, keepdims=True)
    e = jnp.exp(masked - m)
    denom = jnp.sum(e, axis=-1, keepdims=True)
    # approx=False -> exact divide (VPU path); keeps the 1e-5 accuracy target.
    probs = e * pl.reciprocal(denom, approx=False)

    # narrow store: probs | raw value | zeros (probs is already 0 past lane A).
    out_ref[...] = jnp.where(is_value, z, probs)


@functools.partial(jax.jit, static_argnames=("action_dim",))
def actor_critic_forward(x, fused, *, action_dim):
    B, state_dim = x.shape

    # Batch tile: multiple of 8 sublanes, as large as possible (amortizes the
    # ~0.35us per-grid-step overhead), but capped at round_up(B/2, 8) so any
    # B > 8 yields >= 2 grid steps and both v7x TensorCores are used.
    half = _round_up(max(1, (B + 1) // 2), 8)
    TB = max(8, min(TB_MAX, half))
    Bp = _round_up(B, TB)
    if Bp != B:
        x = jnp.pad(x, ((0, Bp - B), (0, 0)))

    w_s, b_s = fused["w_s"], fused["b_s"]
    w_h, b_h = fused["w_h"], fused["b_h"]
    w_o, b_o = fused["w_o"], fused["b_o"]
    out_w = w_o.shape[1]  # narrow slab width (>= action_dim + 1, multiple of 8)

    kernel = functools.partial(actor_critic_kernel, action_dim=action_dim)

    out = pl.pallas_call(
        kernel,
        out_shape=jax.ShapeDtypeStruct((Bp, out_w), jnp.float32),
        grid=(Bp // TB,),
        in_specs=[
            pl.BlockSpec((TB, state_dim), lambda i: (i, 0)),
            # Weights/biases: constant index maps -> no re-DMA across steps.
            pl.BlockSpec(w_s.shape, lambda i: (0, 0)),
            pl.BlockSpec(b_s.shape, lambda i: (0, 0)),
            pl.BlockSpec(w_h.shape, lambda i: (0, 0)),
            pl.BlockSpec(b_h.shape, lambda i: (0, 0)),
            pl.BlockSpec(w_o.shape, lambda i: (0, 0)),
            pl.BlockSpec(b_o.shape, lambda i: (0, 0)),
        ],
        out_specs=pl.BlockSpec((TB, out_w), lambda i: (i, 0)),
        compiler_params=pltpu.CompilerParams(
            dimension_semantics=("parallel",),
            vmem_limit_bytes=32 * 1024 * 1024,
        ),
    )(x, w_s, b_s, w_h, b_h, w_o, b_o)

    probs = out[:B, :action_dim]
    value = out[:B, action_dim:action_dim + 1]
    return probs, value


def init_params(key, state_dim, action_dim, hidden_dim=64):
    """PyTorch nn.Linear-style init, weights stored as [in, out]."""

    def linear(key, fan_in, fan_out):
        kw, kb = jax.random.split(key)
        bound = 1.0 / jnp.sqrt(fan_in)
        w = jax.random.uniform(kw, (fan_in, fan_out), jnp.float32, -bound, bound)
        b = jax.random.uniform(kb, (1, fan_out), jnp.float32, -bound, bound)
        return w, b

    keys = jax.random.split(key, 5)
    w_s, b_s = linear(keys[0], state_dim, hidden_dim)
    w_a1, b_a1 = linear(keys[1], hidden_dim, hidden_dim)
    w_a2, b_a2 = linear(keys[2], hidden_dim, action_dim)
    w_c1, b_c1 = linear(keys[3], hidden_dim, hidden_dim)
    w_c2, b_c2 = linear(keys[4], hidden_dim, 1)
    return dict(
        w_s=w_s, b_s=b_s,
        w_a1=w_a1, b_a1=b_a1,
        w_a2=w_a2, b_a2=b_a2,
        w_c1=w_c1, b_c1=b_c1,
        w_c2=w_c2, b_c2=b_c2,
    )


def fuse_params(p):
    """One-time (outside the hot path) fusion + lane-padding of the weights.

    All padding is with exact zeros, so the fused forward is numerically
    identical to the unfused one.
    """
    state_dim, H = p["w_s"].shape
    action_dim = p["w_a2"].shape[1]

    HP = _round_up(H, 128)                      # padded shared width
    H2 = _round_up(2 * H, 128)                  # padded fused-head width
    OUT_W = _round_up(action_dim + 1, 8)        # narrow output slab width
    assert OUT_W <= 128, "action_dim + value lane must fit in one lane group"

    # shared layer padded to HP output lanes (zero cols -> tanh(0)=0).
    w_s = jnp.zeros((state_dim, HP), jnp.float32).at[:, :H].set(p["w_s"])
    b_s = jnp.zeros((1, HP), jnp.float32).at[:, :H].set(p["b_s"])

    # fused actor/critic hidden layer: actor in cols 0:H, critic in cols H:2H.
    w_h = jnp.zeros((HP, H2), jnp.float32)
    w_h = w_h.at[:H, :H].set(p["w_a1"]).at[:H, H:2 * H].set(p["w_c1"])
    b_h = jnp.zeros((1, H2), jnp.float32)
    b_h = b_h.at[:, :H].set(p["b_a1"]).at[:, H:2 * H].set(p["b_c1"])

    # fused block-diagonal output projection (narrow: OUT_W lanes).
    w_o = jnp.zeros((H2, OUT_W), jnp.float32)
    w_o = w_o.at[:H, :action_dim].set(p["w_a2"])
    w_o = w_o.at[H:2 * H, action_dim:action_dim + 1].set(p["w_c2"])
    b_o = jnp.zeros((1, OUT_W), jnp.float32)
    b_o = b_o.at[:, :action_dim].set(p["b_a2"])
    b_o = b_o.at[:, action_dim:action_dim + 1].set(p["b_c2"])

    return dict(w_s=w_s, b_s=b_s, w_h=w_h, b_h=b_h, w_o=w_o, b_o=b_o)


def reference_forward(x, p):
    """Pure-JAX reference mirroring the PyTorch module semantics."""
    h = jnp.tanh(x @ p["w_s"] + p["b_s"])
    a = jnp.tanh(h @ p["w_a1"] + p["b_a1"])
    logits = a @ p["w_a2"] + p["b_a2"]
    probs = jax.nn.softmax(logits, axis=-1)
    c = jnp.tanh(h @ p["w_c1"] + p["b_c1"])
    value = c @ p["w_c2"] + p["b_c2"]
    return probs, value


if __name__ == "__main__":
    state_dim = 32
    action_dim = 4
    hidden_dim = 64
    batch = 8

    key = jax.random.PRNGKey(0)
    k_params, k_x = jax.random.split(key)
    params = init_params(k_params, state_dim, action_dim, hidden_dim)
    fused = fuse_params(params)  # one-time weight fusion / padding
    x = jax.random.normal(k_x, (batch, state_dim), dtype=jnp.float32)

    probs, value = actor_critic_forward(x, fused, action_dim=action_dim)
    jax.block_until_ready((probs, value))

    ref_probs, ref_value = reference_forward(x, params)
    assert probs.shape == (batch, action_dim)
    assert value.shape == (batch, 1)
    assert jnp.allclose(probs, ref_probs, atol=1e-5, rtol=1e-5)
    assert jnp.allclose(value, ref_value, atol=1e-5, rtol=1e-5)
    assert jnp.allclose(jnp.sum(probs, axis=-1), 1.0, atol=1e-5)

    # Also exercise a multi-step grid (2 tiles) to confirm the parallel grid
    # path used on larger PPO batches.
    x_big = jax.random.normal(k_x, (200, state_dim), dtype=jnp.float32)
    probs_b, value_b = actor_critic_forward(x_big, fused, action_dim=action_dim)
    jax.block_until_ready((probs_b, value_b))
    ref_pb, ref_vb = reference_forward(x_big, params)
    assert jnp.allclose(probs_b, ref_pb, atol=1e-5, rtol=1e-5)
    assert jnp.allclose(value_b, ref_vb, atol=1e-5, rtol=1e-5)

    print("KERNEL_OK")
</pallas_src>

<mosaic_0001>
module attributes {stable_mosaic.version = 11 : i64} {
  func.func @actor_critic_kernel(%arg0: i32, %arg1: memref<8x32xf32, #tpu.memory_space<vmem>>, %arg2: memref<32x128xf32, #tpu.memory_space<vmem>>, %arg3: memref<1x128xf32, #tpu.memory_space<vmem>>, %arg4: memref<128x128xf32, #tpu.memory_space<vmem>>, %arg5: memref<1x128xf32, #tpu.memory_space<vmem>>, %arg6: memref<128x8xf32, #tpu.memory_space<vmem>>, %arg7: memref<1x8xf32, #tpu.memory_space<vmem>>, %arg8: memref<8x8xf32, #tpu.memory_space<vmem>>) attributes {dimension_semantics = [#tpu.dimension_semantics<parallel>], iteration_bounds = array<i64: 1>, scalar_prefetch = 0 : i64, scratch_operands = 0 : i64, tpu.core_type = #tpu.core_type<tc>, window_params = [{transform_indices = @transform_0, window_bounds = array<i64: 8, 32>}, {pipeline_mode = #tpu.pipeline_mode<synchronous>, transform_indices = @transform_1, window_bounds = array<i64: 32, 128>}, {pipeline_mode = #tpu.pipeline_mode<synchronous>, transform_indices = @transform_2, window_bounds = array<i64: 1, 128>}, {pipeline_mode = #tpu.pipeline_mode<synchronous>, transform_indices = @transform_3, window_bounds = array<i64: 128, 128>}, {pipeline_mode = #tpu.pipeline_mode<synchronous>, transform_indices = @transform_4, window_bounds = array<i64: 1, 128>}, {pipeline_mode = #tpu.pipeline_mode<synchronous>, transform_indices = @transform_5, window_bounds = array<i64: 128, 8>}, {pipeline_mode = #tpu.pipeline_mode<synchronous>, transform_indices = @transform_6, window_bounds = array<i64: 1, 8>}, {transform_indices = @transform_7, window_bounds = array<i64: 8, 8>}]} {
    %c0 = arith.constant 0 : index
    %c0_0 = arith.constant 0 : index
    %0 = vector.load %arg1[%c0, %c0_0] : memref<8x32xf32, #tpu.memory_space<vmem>>, vector<8x32xf32>
    %c0_1 = arith.constant 0 : index
    %c0_2 = arith.constant 0 : index
    %1 = vector.load %arg2[%c0_1, %c0_2] : memref<32x128xf32, #tpu.memory_space<vmem>>, vector<32x128xf32>
    %cst = arith.constant dense<0.000000e+00> : vector<8x128xf32>
    %2 = tpu.matmul %0, %1, %cst {dimension_numbers = #tpu.dot_dimension_numbers<[1], [0], [0], [1], [0, 0, 1, 1], [], []>} : vector<8x32xf32>, vector<32x128xf32>, vector<8x128xf32> -> vector<8x128xf32>
    %c0_3 = arith.constant 0 : index
    %c0_4 = arith.constant 0 : index
    %3 = vector.load %arg3[%c0_3, %c0_4] : memref<1x128xf32, #tpu.memory_space<vmem>>, vector<1x128xf32>
    %4 = vector.broadcast %3 : vector<1x128xf32> to vector<8x128xf32>
    %5 = arith.addf %2, %4 : vector<8x128xf32>
    %6 = math.tanh %5 : vector<8x128xf32>
    %c0_5 = arith.constant 0 : index
    %c0_6 = arith.constant 0 : index
    %7 = vector.load %arg4[%c0_5, %c0_6] : memref<128x128xf32, #tpu.memory_space<vmem>>, vector<128x128xf32>
    %cst_7 = arith.constant dense<0.000000e+00> : vector<8x128xf32>
    %8 = tpu.matmul %6, %7, %cst_7 {dimension_numbers = #tpu.dot_dimension_numbers<[1], [0], [0], [1], [0, 0, 1, 1], [], []>} : vector<8x128xf32>, vector<128x128xf32>, vector<8x128xf32> -> vector<8x128xf32>
    %c0_8 = arith.constant 0 : index
    %c0_9 = arith.constant 0 : index
    %9 = vector.load %arg5[%c0_8, %c0_9] : memref<1x128xf32, #tpu.memory_space<vmem>>, vector<1x128xf32>
    %10 = vector.broadcast %9 : vector<1x128xf32> to vector<8x128xf32>
    %11 = arith.addf %8, %10 : vector<8x128xf32>
    %12 = math.tanh %11 : vector<8x128xf32>
    %c0_10 = arith.constant 0 : index
    %c0_11 = arith.constant 0 : index
    %13 = vector.load %arg6[%c0_10, %c0_11] : memref<128x8xf32, #tpu.memory_space<vmem>>, vector<128x8xf32>
    %cst_12 = arith.constant dense<0.000000e+00> : vector<8x8xf32>
    %14 = tpu.matmul %12, %13, %cst_12 {dimension_numbers = #tpu.dot_dimension_numbers<[1], [0], [0], [1], [0, 0, 1, 1], [], []>} : vector<8x128xf32>, vector<128x8xf32>, vector<8x8xf32> -> vector<8x8xf32>
    %c0_13 = arith.constant 0 : index
    %c0_14 = arith.constant 0 : index
    %15 = vector.load %arg7[%c0_13, %c0_14] : memref<1x8xf32, #tpu.memory_space<vmem>>, vector<1x8xf32>
    %16 = vector.broadcast %15 : vector<1x8xf32> to vector<8x8xf32>
    %17 = arith.addf %14, %16 : vector<8x8xf32>
    %18 = tpu.iota {dimensions = array<i32: 1>} : vector<8x8xi32>
    %c4_i32 = arith.constant 4 : i32
    %19 = vector.broadcast %c4_i32 : i32 to vector<8x8xi32>
    %20 = arith.cmpi slt, %18, %19 : vector<8x8xi32>
    %c4_i32_15 = arith.constant 4 : i32
    %21 = vector.broadcast %c4_i32_15 : i32 to vector<8x8xi32>
    %22 = arith.cmpi eq, %18, %21 : vector<8x8xi32>
    %cst_16 = arith.constant -1.000000e+30 : f32
    %23 = vector.broadcast %cst_16 : f32 to vector<8x8xf32>
    %24 = arith.select %20, %17, %23 : vector<8x8xi1>, vector<8x8xf32>
    %cst_17 = arith.constant dense<0xFF800000> : vector<8xf32>
    %25 = vector.multi_reduction <maximumf>, %24, %cst_17 [1] : vector<8x8xf32> to vector<8xf32>
    %26 = vector.shape_cast %25 : vector<8xf32> to vector<8x1xf32>
    %27 = vector.broadcast %26 : vector<8x1xf32> to vector<8x8xf32>
    %28 = arith.subf %24, %27 : vector<8x8xf32>
    %29 = math.exp %28 : vector<8x8xf32>
    %cst_18 = arith.constant dense<0.000000e+00> : vector<8xf32>
    %30 = vector.multi_reduction <add>, %29, %cst_18 [1] : vector<8x8xf32> to vector<8xf32>
    %31 = vector.shape_cast %30 : vector<8xf32> to vector<8x1xf32>
    %32 = tpu.reciprocal %31 : vector<8x1xf32> -> vector<8x1xf32>
    %33 = vector.broadcast %32 : vector<8x1xf32> to vector<8x8xf32>
    %34 = arith.mulf %29, %33 : vector<8x8xf32>
    %35 = arith.select %22, %17, %34 : vector<8x8xi1>, vector<8x8xf32>
    %c0_19 = arith.constant 0 : index
    %c0_20 = arith.constant 0 : index
    %36 = vector.load %arg8[%c0_19, %c0_20] : memref<8x8xf32, #tpu.memory_space<vmem>>, vector<8x8xf32>
    tpu.vector_store %arg8[%c0_19, %c0_20], %35 {strides = array<i32>} : memref<8x8xf32, #tpu.memory_space<vmem>>, vector<8x8xf32>,
    return
  }
  func.func @transform_0(%arg0: i32) -> (i32, i32) {
    %c0_i32 = arith.constant 0 : i32
    %c0_i32_0 = arith.constant 0 : i32
    return %arg0, %c0_i32 : i32, i32
  }
  func.func @transform_1(%arg0: i32) -> (i32, i32) {
    %c0_i32 = arith.constant 0 : i32
    %c0_i32_0 = arith.constant 0 : i32
    %c0_i32_1 = arith.constant 0 : i32
    return %c0_i32, %c0_i32_0 : i32, i32
  }
  func.func @transform_2(%arg0: i32) -> (i32, i32) {
    %c0_i32 = arith.constant 0 : i32
    %c0_i32_0 = arith.constant 0 : i32
    %c0_i32_1 = arith.constant 0 : i32
    return %c0_i32, %c0_i32_0 : i32, i32
  }
  func.func @transform_3(%arg0: i32) -> (i32, i32) {
    %c0_i32 = arith.constant 0 : i32
    %c0_i32_0 = arith.constant 0 : i32
    %c0_i32_1 = arith.constant 0 : i32
    return %c0_i32, %c0_i32_0 : i32, i32
  }
  func.func @transform_4(%arg0: i32) -> (i32, i32) {
    %c0_i32 = arith.constant 0 : i32
    %c0_i32_0 = arith.constant 0 : i32
    %c0_i32_1 = arith.constant 0 : i32
    return %c0_i32, %c0_i32_0 : i32, i32
  }
  func.func @transform_5(%arg0: i32) -> (i32, i32) {
    %c0_i32 = arith.constant 0 : i32
    %c0_i32_0 = arith.constant 0 : i32
    %c0_i32_1 = arith.constant 0 : i32
    return %c0_i32, %c0_i32_0 : i32, i32
  }
  func.func @transform_6(%arg0: i32) -> (i32, i32) {
    %c0_i32 = arith.constant 0 : i32
    %c0_i32_0 = arith.constant 0 : i32
    %c0_i32_1 = arith.constant 0 : i32
    return %c0_i32, %c0_i32_0 : i32, i32
  }
  func.func @transform_7(%arg0: i32) -> (i32, i32) {
    %c0_i32 = arith.constant 0 : i32
    %c0_i32_0 = arith.constant 0 : i32
    return %arg0, %c0_i32 : i32, i32
  }
}

</mosaic_0001>

<bundles_post_ra>
// kernel: actor_critic_forward.1
= control target key start
LH: loop header
LB: loop body
LE: loop exit
PB: predicated region body
PF: predicated region fallthrough
CT: control target
= control target key end

     0   :  { %12 = vsyncpa [#allocation3], 0  ;;  %s771_s0 = inlined_call_operand.vmem [shape: f32[8,32], index: 0, kind: input, shape index: {}]   ;;  %s772_s1 = inlined_call_operand.hbm [shape: f32[32,128], index: 1, kind: input, shape index: {}]   ;;  %s773_s2 = inlined_call_operand.vmem [shape: f32[1,128], index: 2, kind: input, shape index: {}]   ;;  %s774_s3 = inlined_call_operand.vmem [shape: f32[128,128], index: 3, kind: input, shape index: {}]   ;;  %s775_s4 = inlined_call_operand.hbm [shape: f32[1,128], index: 4, kind: input, shape index: {}]   ;;  %s776_s5 = inlined_call_operand.vmem [shape: f32[128,8], index: 5, kind: input, shape index: {}]   ;;  %s777_s6 = inlined_call_operand.hbm [shape: f32[1,8], index: 6, kind: input, shape index: {}]   ;;  %s778_s7 = inlined_call_operand.vmem [shape: f32[8,8], index: 7, kind: output, shape index: {}]  }
   0x1   :  { %13 = vsyncpa [#allocation5], 0  ;;  %s565_s24 = smov [#allocation4]   ;;  %s566_s26 = smov [#allocation2]  }
   0x2   :  { %s38_s25 = sshll.u32 %s565_s24, 4  ;;  %s21_s27 = sshll.u32 %s566_s26, 4  ;;  %s39_s25 = int_to_ptr.vmem [resolvable:$true] %s38_s25  ;;  %s22_s27 = int_to_ptr.vmem [resolvable:$true] %s21_s27 }
   0x3   :  { %s509_s28 = scalar_lea.vmem %s39_s25, 16  ;;  %s513_s29 = scalar_lea.vmem %s39_s25, 32 }
   0x4   :  { %p510_p0 = scmp.ne.s32.totalorder %s39_s25, %s509_s28  ;;  %p514_p1 = scmp.lt.s32.totalorder %s39_s25, %s39_s25 }
   0x5   :  { %p515_p2 = scmp.lt.s32.totalorder %s513_s29, %s509_s28 }
   0x7   :  { %p516_p3 = por %p515_p2, %p514_p1 }
   0x9   :  { %p517_p4 = pnand %p516_p3, %p510_p0 }
   0xb   :  { %520 = shalt.err (!%p517_p4)
}
   0xc   :  { %41 = dma.hbm_to_vmem [thread:$0]  %s775_s4, 16, %s39_s25, [#allocation5]  }
   0xd   :  { %s529_s9 = scalar_lea.vmem %s22_s27, 512  ;;  %p534_p6 = scmp.lt.s32.totalorder %s22_s27, %s22_s27 }
   0xe   :  { %p530_p5 = scmp.ne.s32.totalorder %s22_s27, %s529_s9  ;;  %p535_p7 = scmp.lt.s32.totalorder %s529_s9, %s529_s9 }
  0x10   :  { %p536_p8 = por %p535_p7, %p534_p6 }
  0x12   :  { %p537_p9 = pnand %p536_p8, %p530_p5 }
  0x14   :  { %540 = shalt.err (!%p537_p9)
}
  0x15   :  { %s567_s10 = smov 128   ;;  %s568_s11 = smov 8  }
  0x16   :  { %27 = dma.hbm_to_vmem [thread:$0]  %s772_s1, 512, %s22_s27, [#allocation3], %s567_s10, %s567_s10, %s568_s11  }
  0x17   :  { %s569_s14 = smov [#allocation6]  }
  0x18   :  { %s50_s15 = sshll.u32 %s569_s14, 4  ;;  %s51_s15 = int_to_ptr.vmem [resolvable:$true] %s50_s15 }
  0x19   :  { %s549_s16 = scalar_lea.vmem %s51_s15, 16  ;;  %s553_s17 = scalar_lea.vmem %s51_s15, 32 }
  0x1a   :  { %p550_p10 = scmp.ne.s32.totalorder %s51_s15, %s549_s16  ;;  %p554_p11 = scmp.lt.s32.totalorder %s51_s15, %s51_s15 }
  0x1b   :  { %p555_p12 = scmp.lt.s32.totalorder %s553_s17, %s549_s16 }
  0x1d   :  { %p556_p13 = por %p555_p12, %p554_p11 }
  0x1f   :  { %p557_p0 = pnand %p556_p13, %p550_p10 }
  0x21   :  { %560 = shalt.err (!%p557_p0)
}
  0x22   :  { %53 = dma.hbm_to_vmem [thread:$0]  %s777_s6, 16, %s51_s15, [#allocation5]  }
  0x23   :  { %561 = dma.done.wait [#allocation3], 512  }
  0x24   :  { %562 = vsyncadd [#allocation3], 4294966784 }
  0x25   :  { %563 = dma.done.wait [#allocation5], 32  }
  0x26   :  { %564 = vsyncadd [#allocation5], 4294967264  ;;  %v570_v0 = vmov 0.0   ;;  %vm571_vm0 = vmmov 0   ;;  %v67_v1 = vld [vmem:[#allocation2 + $0x18] sm:$0xff]  ;;  %v66_v2 = vld [vmem:[#allocation2 + $0x10] sm:$0xff]  ;;  %v337_v48 = vlaneseq }
  0x27   :  { %405 = vmatprep.subr.mxu0 %v570_v0  ;;  %413 = vmatprep.mubr.msk.f32.mxu0 %vm571_vm0, %v570_v0  ;;  %v165_v3 = vld [vmem:[%s774_s3 + $0x78] sm:$0xff]  ;;  %v65_v4 = vld [vmem:[#allocation2 + $0x8] sm:$0xff]  ;;  %v164_v5 = vld [vmem:[%s774_s3 + $0x70] sm:$0xff]  ;;  %vm75_vm1 = vcmask 261120   ;;  %vm342_vm3 = vcmask 64512  }
  0x28   :  { %416 = vmatprep.subr.mxu1 %v570_v0  ;;  %448 = vmatprep.mubr.msk.f32.mxu1 %vm571_vm0, %v570_v0  ;;  %v163_v6 = vld [vmem:[%s774_s3 + $0x68] sm:$0xff]  ;;  %v64_v7 = vld [vmem:[#allocation2] sm:$0xff]  ;;  %v161_v10 = vld [vmem:[%s774_s3 + $0x58] sm:$0xff]  ;;  %v338_v49 = vand.u32 127, %v337_v48 }
  0x29   :  { %406 = vmatpush3.msra.mxu0 %v67_v1  ;;  %417 = vmatpush3.msra.mxu1 %v165_v3  ;;  %v63_v8 = vld [vmem:[%s771_s0] sm:$0xff]  ;;  %v160_v11 = vld [vmem:[%s774_s3 + $0x50] sm:$0xff]  ;;  %v159_v12 = vld [vmem:[%s774_s3 + $0x48] sm:$0xff] }
  0x2a   :  { %407 = vmatprep.subr.mxu0 %v570_v0  ;;  %418 = vmatprep.subr.mxu1 %v570_v0  ;;  %v162_v9 = vld [vmem:[%s774_s3 + $0x60] sm:$0xff]  ;;  %v157_v14 = vld [vmem:[%s774_s3 + $0x38] sm:$0xff]  ;;  %v156_v15 = vld [vmem:[%s774_s3 + $0x30] sm:$0xff]  ;;  %vm339_vm2 = vcmp.lt.s32.totalorder %v338_v49, 4  ;;  %vm340_vm4 = vcmp.eq.s32.totalorder %v338_v49, 4 }
  0x2b   :  { %408 = vmatpush3.msra.mxu0 %v66_v2  ;;  %419 = vmatpush3.msra.mxu1 %v164_v5  ;;  %v158_v13 = vld [vmem:[%s774_s3 + $0x40] sm:$0xff]  ;;  %v155_v16 = vld [vmem:[%s774_s3 + $0x28] sm:$0xff]  ;;  %v153_v18 = vld [vmem:[%s774_s3 + $0x18] sm:$0xff] }
  0x2c   :  { %409 = vmatprep.subr.mxu0 %v570_v0  ;;  %420 = vmatprep.subr.mxu1 %v570_v0  ;;  %v154_v17 = vld [vmem:[%s774_s3 + $0x20] sm:$0xff]  ;;  %v152_v19 = vld [vmem:[%s774_s3 + $0x10] sm:$0xff]  ;;  %v151_v20 = vld [vmem:[%s774_s3 + $0x8] sm:$0xff] }
  0x2d   :  { %410 = vmatpush3.msra.mxu0 %v65_v4  ;;  %421 = vmatpush3.msra.mxu1 %v163_v6  ;;  %v150_v21 = vld [vmem:[%s774_s3] sm:$0xff]  ;;  %v259_v22 = vld [vmem:[%s776_s5 + $0x78] sm:$0xff]  ;;  %v258_v23 = vld [vmem:[%s776_s5 + $0x70] sm:$0xff] }
  0x2e   :  { %411 = vmatprep.subr.mxu0 %v570_v0  ;;  %422 = vmatprep.subr.mxu1 %v570_v0  ;;  %v257_v24 = vld [vmem:[%s776_s5 + $0x68] sm:$0xff]  ;;  %v256_v25 = vld [vmem:[%s776_s5 + $0x60] sm:$0xff]  ;;  %v255_v26 = vld [vmem:[%s776_s5 + $0x58] sm:$0xff] }
  0x2f   :  { %412 = vmatpush3.msra.mxu0 %v64_v7  ;;  %423 = vmatpush3.msra.mxu1 %v162_v9  ;;  %v254_v27 = vld [vmem:[%s776_s5 + $0x50] sm:$0xff]  ;;  %v253_v28 = vld [vmem:[%s776_s5 + $0x48] sm:$0xff]  ;;  %v362_v29 = vld [vmem:[%s773_s2] ss:$0 sm:$0xff] }
  0x30   :  { %414 = vmatmul.mubr.msk.f32.vlgmr.msra.gmra.mxu0 %vm75_vm1, %v63_v8  ;;  %424 = vmatprep.subr.mxu1 %v570_v0  ;;  %v252_v34 = vld [vmem:[%s776_s5 + $0x40] sm:$0xff]  ;;  %v251_v35 = vld [vmem:[%s776_s5 + $0x38] sm:$0xff]  ;;  %v250_v36 = vld [vmem:[%s776_s5 + $0x30] sm:$0xff] }
  0x31   :  { %451 = vmatprep.subr.mxu0 %v570_v0  ;;  %425 = vmatpush3.msra.mxu1 %v161_v10  ;;  %v249_v37 = vld [vmem:[%s776_s5 + $0x28] sm:$0xff]  ;;  %v248_v38 = vld [vmem:[%s776_s5 + $0x20] sm:$0xff]  ;;  %v247_v39 = vld [vmem:[%s776_s5 + $0x18] sm:$0xff] }
  0x32   :  { %483 = vmatprep.mubr.msk.f32.mxu0 %vm571_vm0, %v570_v0  ;;  %426 = vmatprep.subr.mxu1 %v570_v0  ;;  %v246_v40 = vld [vmem:[%s776_s5 + $0x10] sm:$0xff]  ;;  %v245_v41 = vld [vmem:[%s776_s5 + $0x8] sm:$0xff]  ;;  %v244_v42 = vld [vmem:[%s776_s5] sm:$0xff] }
  0x33   :  { %427 = vmatpush3.msra.mxu1 %v160_v11  ;;  %452 = vmatpush3.msra.mxu0 %v259_v22  ;;  %v364_v43 = vld [vmem:[#allocation4] ss:$0 sm:$0xff]  ;;  %v365_v50 = vld [vmem:[#allocation6] ss:$0 sm:$0xff] }
  0x34   :  { %428 = vmatprep.subr.mxu1 %v570_v0  ;;  %453 = vmatprep.subr.mxu0 %v570_v0 }
  0x35   :  { %429 = vmatpush3.msra.mxu1 %v159_v12  ;;  %454 = vmatpush3.msra.mxu0 %v258_v23 }
  0x36   :  { %430 = vmatprep.subr.mxu1 %v570_v0  ;;  %455 = vmatprep.subr.mxu0 %v570_v0 }
  0x37   :  { %431 = vmatpush3.msra.mxu1 %v158_v13  ;;  %456 = vmatpush3.msra.mxu0 %v257_v24 }
  0x38   :  { %432 = vmatprep.subr.mxu1 %v570_v0  ;;  %457 = vmatprep.subr.mxu0 %v570_v0 }
  0x39   :  { %433 = vmatpush3.msra.mxu1 %v157_v14  ;;  %458 = vmatpush3.msra.mxu0 %v256_v25 }
  0x3a   :  { %434 = vmatprep.subr.mxu1 %v570_v0  ;;  %459 = vmatprep.subr.mxu0 %v570_v0 }
  0x3b   :  { %435 = vmatpush3.msra.mxu1 %v156_v15  ;;  %460 = vmatpush3.msra.mxu0 %v255_v26 }
  0x3c   :  { %436 = vmatprep.subr.mxu1 %v570_v0  ;;  %461 = vmatprep.subr.mxu0 %v570_v0 }
  0x3d   :  { %437 = vmatpush3.msra.mxu1 %v155_v16  ;;  %462 = vmatpush3.msra.mxu0 %v254_v27 }
  0x3e   :  { %438 = vmatprep.subr.mxu1 %v570_v0  ;;  %463 = vmatprep.subr.mxu0 %v570_v0 }
  0x3f   :  { %439 = vmatpush3.msra.mxu1 %v154_v17  ;;  %464 = vmatpush3.msra.mxu0 %v253_v28 }
  0x40   :  { %440 = vmatprep.subr.mxu1 %v570_v0  ;;  %465 = vmatprep.subr.mxu0 %v570_v0 }
  0x41   :  { %441 = vmatpush3.msra.mxu1 %v153_v18  ;;  %466 = vmatpush3.msra.mxu0 %v252_v34 }
  0x42   :  { %442 = vmatprep.subr.mxu1 %v570_v0  ;;  %467 = vmatprep.subr.mxu0 %v570_v0 }
  0x43   :  { %443 = vmatpush3.msra.mxu1 %v152_v19  ;;  %468 = vmatpush3.msra.mxu0 %v251_v35 }
  0x44   :  { %444 = vmatprep.subr.mxu1 %v570_v0  ;;  %469 = vmatprep.subr.mxu0 %v570_v0 }
  0x45   :  { %445 = vmatpush3.msra.mxu1 %v151_v20  ;;  %470 = vmatpush3.msra.mxu0 %v250_v36 }
  0x46   :  { %446 = vmatprep.subr.mxu1 %v570_v0  ;;  %471 = vmatprep.subr.mxu0 %v570_v0 }
  0x47   :  { %447 = vmatpush3.msra.mxu1 %v150_v21  ;;  %472 = vmatpush3.msra.mxu0 %v249_v37 }
  0x48   :  { %473 = vmatprep.subr.mxu0 %v570_v0 }
  0x49   :  { %474 = vmatpush3.msra.mxu0 %v248_v38 }
  0x4a   :  { %475 = vmatprep.subr.mxu0 %v570_v0 }
  0x4b   :  { %476 = vmatpush3.msra.mxu0 %v247_v39 }
  0x4c   :  { %477 = vmatprep.subr.mxu0 %v570_v0 }
  0x4d   :  { %478 = vmatpush3.msra.mxu0 %v246_v40 }
  0x4e   :  { %479 = vmatprep.subr.mxu0 %v570_v0 }
  0x4f   :  { %480 = vmatpush3.msra.mxu0 %v245_v41 }
  0x50   :  { %481 = vmatprep.subr.mxu0 %v570_v0 }
  0x51   :  { %482 = vmatpush3.msra.mxu0 %v244_v42 }
  0xf0   :  { %v145_v30 = vpop.f32.mrf.mxu0 }
  0xf1   :  { %v146_v31 = vadd.f32 %v362_v29, %v145_v30 }
  0xf2   :  { %v415_v32 = vpop.f32.mrf.mxu0 }
  0xf3   :  { %493 = vtanh.f32 %v146_v31 }
 0x100   :  { %v494_v33 = vpop.eup %493 }
 0x101   :  { %449 = vmatmul.mubr.f32.vlgmr.msra.gmra.mxu1 %v494_v33 }
 0x1c1   :  { %v239_v44 = vpop.f32.mrf.mxu1 }
 0x1c2   :  { %v240_v45 = vadd.f32 %v364_v43, %v239_v44 }
 0x1c3   :  { %v450_v46 = vpop.f32.mrf.mxu1 }
 0x1c4   :  { %495 = vtanh.f32 %v240_v45 }
 0x1d1   :  { %v496_v47 = vpop.eup %495 }
 0x1d2   :  { %484 = vmatmul.mubr.f32.vlgmr.msra.gmra.mxu0 %v496_v47 }
 0x292   :  { %v333_v51 = vpop.f32.mrf.mxu0 }
 0x293   :  { %v334_v52 = vadd.f32 %v365_v50, %v333_v51 }
 0x294   :  { %v485_v53 = vpop.f32.mrf.mxu0 }
 0x295   :  { %v341_v54 = vsel %vm339_vm2, %v334_v52, -1e+30 }
 0x296   :  { %v343_v55 = vsel %vm342_vm3, %v341_v54, -inf }
 0x297   :  { %344 = vmax.xlane.f32.xlu0 %v343_v55 }
 0x320   :  { %v345_v56 = vpop.xlane.xlu0 %344 }
 0x321   :  { %v346_v57 = vsub.f32 %v341_v54, %v345_v56 }
 0x323   :  { %v347_v58 = vmul.f32 1.442695, %v346_v57 }
 0x325   :  { %497 = vpow2.f32 %v347_v58 }
 0x332   :  { %v498_v59 = vpop.eup %497 }
 0x333   :  { %v349_v60 = vsel %vm342_vm3, %v498_v59, 0.0 }
 0x334   :  { %350 = vadd.xlane.f32.xlu0 %v349_v60 }
 0x3bd   :  { %v351_v61 = vpop.xlane.xlu0 %350 }
 0x3be   :  { %499 = vrcp.f32 %v351_v61 }
 0x3cb   :  { %v500_v62 = vpop.eup %499 }
 0x3cc   :  { %v353_v63 = vmul.f32 %v500_v62, %v498_v59 }
 0x3ce   :  { %v354_v0 = vsel %vm340_vm4, %v334_v52, %v353_v63 }
 0x3cf   :  { %355 = vst.msk [vmem:[%s778_s7] sm:$0xff] %vm342_vm3, %v354_v0 }
 0x3d0   :  { %360 = vsyncpa [#allocation3], 1 }
 0x3d1   :  { %361 = vsyncpa [#allocation5], 1 }

</bundles_post_ra>
